<compile_context>
chip_gen: v5e
topology: v5e:2x2
jax: 0.10.0
libtpu: 0.0.40
codegen_flags: <defaults>
</compile_context>

<pallas_src>
import functools

import jax
import jax.numpy as jnp
from jax.experimental import pallas as pl
from jax.experimental.pallas import tpu as pltpu


# ----------------------------- helpers --------------------------------------


def _round_up(x, m):
    return ((x + m - 1) // m) * m


def _round_down(x, m):
    return (x // m) * m


def _vmem_capacity_bytes():
    try:
        return int(pltpu.get_tpu_info().vmem_capacity_bytes)
    except Exception:
        return 64 << 20  # conservative (v7x-sized) fallback


def _bf16_eup_ok():
    # bf16 VPU/EUP exists on v6e and newer; keep f32 math on v5e and older.
    try:
        kind = jax.devices()[0].device_kind.lower()
    except Exception:
        return False
    return not any(tag in kind for tag in ("v2", "v3", "v4", "v5"))


# ----------------------------- kernels --------------------------------------


def _softmax_times_x(x, z, exp_dtype):
    # softmax(z, axis=-1) * x, accumulation in f32.
    m = jnp.max(z, axis=-1, keepdims=True)
    zc = z - m
    if exp_dtype == jnp.float32:
        e = jnp.exp(zc)
    else:
        # bf16 EUP exp (v6e/v7x): ~2x EUP throughput, sum stays in f32.
        e = jnp.exp(zc.astype(exp_dtype)).astype(jnp.float32)
    denom = jnp.sum(e, axis=-1, keepdims=True)
    # EUP approximate reciprocal + one Newton-Raphson step: off the VALU,
    # ~full f32 precision (denom >= 1 since the max was subtracted).
    inv = pl.reciprocal(denom, approx=True)
    inv = inv * (2.0 - denom * inv)
    return e * inv * x


def _fovea_kernel(x_ref, o_ref, *, smooth_const, exp_dtype):
    # x_ref: (TR, HW) tile of independent rows.
    x = x_ref[...].astype(jnp.float32)
    z = x if smooth_const is None else x * smooth_const
    o_ref[...] = _softmax_times_x(x, z, exp_dtype).astype(o_ref.dtype)


def _fovea_kernel_smem_smooth(smooth_ref, x_ref, o_ref, *, exp_dtype):
    # smooth is a traced learned scalar living in SMEM.
    x = x_ref[...].astype(jnp.float32)
    z = x * smooth_ref[0]
    o_ref[...] = _softmax_times_x(x, z, exp_dtype).astype(o_ref.dtype)


# ----------------------------- tiling policy ---------------------------------


def _pick_tile_rows(rows, hw, in_itemsize, out_itemsize):
    capacity = _vmem_capacity_bytes()
    # Pipeline budget ~= 1/4 of VMEM (~16 MiB on v7x, ~32 MiB on v5e/v6e).
    pipeline_budget = capacity // 4

    # Sublane packing: 8 rows/vreg for f32, 16 for bf16, 32 for int8/fp8.
    align = max(8, 32 // max(1, in_itemsize))

    # Per-row footprint: double-buffered in+out tiles in x.dtype plus ~3 f32
    # temporaries (upcast x, exp, product) materialized by the compute path.
    bytes_per_row = 2 * hw * (in_itemsize + out_itemsize) + 3 * hw * 4
    tr_budget = max(align, _round_down(pipeline_budget // bytes_per_row, align))

    # Target >= ~8 grid steps (software pipeline + both TensorCores on v7x)...
    steps_cap = _round_up(pl.cdiv(rows, 8), align)
    tr = min(tr_budget, steps_cap)

    # ...but keep >= ~512 KiB of input per step so the ~0.35us/step grid
    # overhead stays amortized when hw is small.
    floor = max(align, _round_down((512 << 10) // max(1, hw * in_itemsize), align))
    tr = max(tr, min(floor, tr_budget))

    tr = max(8, _round_down(tr, 8))
    if tr >= rows:
        # Only reachable when the whole problem is tiny (< ~1 tile of data);
        # a single full-row block is both legal and the right call there.
        tr = rows
    return tr


# ----------------------------- wrapper ---------------------------------------


def fovea(x, smooth=False, smooth_value=10.0, tile_rows=None, donate_input=False):
    """Fovea forward. x: [b, c, h, w]. Returns [b, c, h, w]."""
    b, c, h, w = x.shape
    hw = h * w
    rows = b * c
    x2d = x.reshape(rows, hw)

    in_itemsize = jnp.dtype(x.dtype).itemsize
    out_itemsize = in_itemsize

    if tile_rows is not None:
        tr = int(tile_rows)
        if tr >= rows:
            tr = rows
        else:
            # (8,128) BlockSpec rule: non-full row blocks must be a multiple of 8.
            tr = max(8, _round_down(tr, 8))
    else:
        tr = _pick_tile_rows(rows, hw, in_itemsize, out_itemsize)

    grid = (pl.cdiv(rows, tr),)

    # Generation-aware VMEM limit: actual footprint (double-buffered I/O tiles
    # + f32 temps) + headroom, capped per chip generation.
    capacity = _vmem_capacity_bytes()
    tile_in = tr * hw * in_itemsize
    tile_out = tr * hw * out_itemsize
    footprint = 2 * (tile_in + tile_out) + 3 * tr * hw * 4
    cap = (40 << 20) if capacity <= (64 << 20) else (96 << 20)
    vmem_limit = int(min(max(16 << 20, footprint + (4 << 20)), cap))

    compiler_params = pltpu.CompilerParams(
        # "parallel" lets Mosaic shard the row axis across TensorCores on v7x.
        dimension_semantics=("parallel",),
        vmem_limit_bytes=vmem_limit,
    )

    # bf16 exp only where the EUP is bf16-capable (v6e/v7x) and input is bf16.
    exp_dtype = (
        jnp.bfloat16 if (x.dtype == jnp.bfloat16 and _bf16_eup_ok()) else jnp.float32
    )

    x_spec = pl.BlockSpec((tr, hw), lambda i: (i, 0))
    out_spec = pl.BlockSpec((tr, hw), lambda i: (i, 0))
    out_shape = jax.ShapeDtypeStruct((rows, hw), x.dtype)

    use_smem_smooth = bool(smooth) and not isinstance(smooth_value, (int, float))

    if use_smem_smooth:
        kernel = functools.partial(_fovea_kernel_smem_smooth, exp_dtype=exp_dtype)
        smooth_arr = jnp.asarray(smooth_value, dtype=jnp.float32).reshape((1,))
        in_specs = [
            pl.BlockSpec(memory_space=pltpu.MemorySpace.SMEM),  # learned scalar
            x_spec,
        ]
        operands = (smooth_arr, x2d)
        x_operand_index = 1
    else:
        smooth_const = float(smooth_value) if smooth else None
        kernel = functools.partial(
            _fovea_kernel, smooth_const=smooth_const, exp_dtype=exp_dtype
        )
        in_specs = [x_spec]
        operands = (x2d,)
        x_operand_index = 0

    # In-place output (saves the output HBM allocation). Only when the row
    # count divides the tile evenly, so ragged-last-block handling can never
    # interact with the in-place update.
    io_aliases = {}
    if donate_input and rows % tr == 0:
        io_aliases = {x_operand_index: 0}

    out2d = pl.pallas_call(
        kernel,
        out_shape=out_shape,
        grid_spec=pltpu.PrefetchScalarGridSpec(
            num_scalar_prefetch=0,
            grid=grid,
            in_specs=in_specs,
            out_specs=out_spec,
        ),
        compiler_params=compiler_params,
        input_output_aliases=io_aliases,
    )(*operands)

    return out2d.reshape(b, c, h, w)


# ----------------------------- reference -------------------------------------


def _fovea_ref(x, smooth=False, smooth_value=10.0):
    b, c, h, w = x.shape
    x2 = x.reshape(b, c, h * w).astype(jnp.float32)
    z = x2 * smooth_value if smooth else x2
    mask = jax.nn.softmax(z, axis=-1)
    return (mask * x2).reshape(b, c, h, w)


# ----------------------------- tests ------------------------------------------


if __name__ == "__main__":
    key = jax.random.PRNGKey(0)
    b, c, h, w = 2, 4, 16, 16
    x = jax.random.normal(key, (b, c, h, w), dtype=jnp.float32)

    # 1) default module config: smooth=False
    out = fovea(x, smooth=False)
    jax.block_until_ready(out)
    ref = _fovea_ref(x, smooth=False)
    assert out.shape == (b, c, h, w)
    assert jnp.allclose(out, ref, atol=1e-5, rtol=1e-4)

    # 2) smooth=True with Python-float value (baked constant, no SMEM operand)
    out_s = fovea(x, smooth=True, smooth_value=10.0)
    jax.block_until_ready(out_s)
    ref_s = _fovea_ref(x, smooth=True, smooth_value=10.0)
    assert jnp.allclose(out_s, ref_s, atol=1e-5, rtol=1e-4)

    # 3) smooth=True with a traced learned scalar (SMEM path)
    smooth_param = jnp.full((1,), 10.0, dtype=jnp.float32)
    out_p = fovea(x, smooth=True, smooth_value=smooth_param)
    jax.block_until_ready(out_p)
    assert jnp.allclose(out_p, ref_s, atol=1e-5, rtol=1e-4)

    # 4) multi-block + ragged last block (rows=40 not a multiple of tile=16)
    b2, c2 = 2, 20
    x2 = jax.random.normal(jax.random.PRNGKey(1), (b2, c2, h, w), dtype=jnp.float32)
    out2 = fovea(x2, smooth=False, tile_rows=16)
    jax.block_until_ready(out2)
    ref2 = _fovea_ref(x2, smooth=False)
    assert jnp.allclose(out2, ref2, atol=1e-5, rtol=1e-4)

    # 5) bf16 input, ragged multi-block (exercises bf16-exp path on v6e/v7x)
    x3 = jax.random.normal(jax.random.PRNGKey(2), (b2, c2, h, w)).astype(jnp.bfloat16)
    out3 = fovea(x3, smooth=False, tile_rows=16)
    jax.block_until_ready(out3)
    ref3 = _fovea_ref(x3, smooth=False)
    assert jnp.allclose(out3.astype(jnp.float32), ref3, atol=2e-2, rtol=5e-2)

    # 6) auto-tiled multi-step path at SAM-like hw (64x64 tokens)
    x4 = jax.random.normal(jax.random.PRNGKey(3), (1, 96, 64, 64), dtype=jnp.float32)
    out4 = fovea(x4, smooth=False)
    jax.block_until_ready(out4)
    ref4 = _fovea_ref(x4, smooth=False)
    assert jnp.allclose(out4, ref4, atol=1e-5, rtol=1e-4)

    # 7) in-place output (input_output_aliases) on an evenly tiled shape
    x5 = jax.random.normal(jax.random.PRNGKey(4), (b, c, h, w), dtype=jnp.float32)
    ref5 = _fovea_ref(x5, smooth=False)
    out5 = fovea(x5, smooth=False, donate_input=True)
    jax.block_until_ready(out5)
    assert jnp.allclose(out5, ref5, atol=1e-5, rtol=1e-4)

    print("KERNEL_OK")
</pallas_src>

<mosaic_0001>
module attributes {stable_mosaic.version = 11 : i64} {
  func.func @_fovea_kernel(%arg0: i32, %arg1: memref<8x256xf32, #tpu.memory_space<vmem>>, %arg2: memref<8x256xf32, #tpu.memory_space<vmem>>) attributes {dimension_semantics = [#tpu.dimension_semantics<parallel>], iteration_bounds = array<i64: 1>, scalar_prefetch = 0 : i64, scratch_operands = 0 : i64, tpu.core_type = #tpu.core_type<tc>, window_params = [{transform_indices = @transform_0, window_bounds = array<i64: 8, 256>}, {transform_indices = @transform_1, window_bounds = array<i64: 8, 256>}]} {
    %c0 = arith.constant 0 : index
    %c0_0 = arith.constant 0 : index
    %0 = vector.load %arg1[%c0, %c0_0] : memref<8x256xf32, #tpu.memory_space<vmem>>, vector<8x256xf32>
    %cst = arith.constant dense<0xFF800000> : vector<8xf32>
    %1 = vector.multi_reduction <maximumf>, %0, %cst [1] : vector<8x256xf32> to vector<8xf32>
    %2 = vector.shape_cast %1 : vector<8xf32> to vector<8x1xf32>
    %3 = vector.broadcast %2 : vector<8x1xf32> to vector<8x256xf32>
    %4 = arith.subf %0, %3 : vector<8x256xf32>
    %5 = math.exp %4 : vector<8x256xf32>
    %cst_1 = arith.constant dense<0.000000e+00> : vector<8xf32>
    %6 = vector.multi_reduction <add>, %5, %cst_1 [1] : vector<8x256xf32> to vector<8xf32>
    %7 = vector.shape_cast %6 : vector<8xf32> to vector<8x1xf32>
    %8 = tpu.reciprocal %7 {approx = true} : vector<8x1xf32> -> vector<8x1xf32>
    %9 = arith.mulf %7, %8 : vector<8x1xf32>
    %cst_2 = arith.constant 2.000000e+00 : f32
    %10 = vector.broadcast %cst_2 : f32 to vector<8x1xf32>
    %11 = arith.subf %10, %9 : vector<8x1xf32>
    %12 = arith.mulf %8, %11 : vector<8x1xf32>
    %13 = vector.broadcast %12 : vector<8x1xf32> to vector<8x256xf32>
    %14 = arith.mulf %5, %13 : vector<8x256xf32>
    %15 = arith.mulf %14, %0 : vector<8x256xf32>
    %c0_3 = arith.constant 0 : index
    %c0_4 = arith.constant 0 : index
    %16 = vector.load %arg2[%c0_3, %c0_4] : memref<8x256xf32, #tpu.memory_space<vmem>>, vector<8x256xf32>
    tpu.vector_store %arg2[%c0_3, %c0_4], %15 {strides = array<i32>} : memref<8x256xf32, #tpu.memory_space<vmem>>, vector<8x256xf32>,
    return
  }
  func.func @transform_0(%arg0: i32) -> (i32, i32) {
    %c0_i32 = arith.constant 0 : i32
    %c0_i32_0 = arith.constant 0 : i32
    return %arg0, %c0_i32 : i32, i32
  }
  func.func @transform_1(%arg0: i32) -> (i32, i32) {
    %c0_i32 = arith.constant 0 : i32
    %c0_i32_0 = arith.constant 0 : i32
    return %arg0, %c0_i32 : i32, i32
  }
}

</mosaic_0001>

<bundles_post_ra>
// kernel: tpu_custom_call.1
= control target key start
LH: loop header
LB: loop body
LE: loop exit
PB: predicated region body
PF: predicated region fallthrough
CT: control target
= control target key end

     0   :  { %6 = vsyncpa [#allocation3], 0  ;;  %s142_s0 = inlined_call_operand.hbm [shape: f32[8,256], index: 0, kind: input, shape index: {}]   ;;  %s143_s1 = inlined_call_operand.hbm [shape: f32[8,256], index: 1, kind: output, shape index: {}]  }
   0x1   :  { %7 = vsyncpa [#allocation4], 0  ;;  %s13_s8 = sshll.u32 %s142_s0, 4  ;;  %s124_s9 = smov [#allocation2]   ;;  %s14_s8 = int_to_ptr.hbm [resolvable:$true] %s13_s8 }
   0x2   :  { %s15_s10 = sshll.u32 %s124_s9, 4  ;;  %s16_s10 = int_to_ptr.vmem [resolvable:$true] %s15_s10 }
   0x3   :  { %18 = dma.hbm_to_vmem [thread:$0]  %s14_s8, 256, %s16_s10, [#allocation3]  }
   0x4   :  { %120 = dma.done.wait [#allocation3], 256  }
   0x5   :  { %121 = vsyncadd [#allocation3], 4294967040  ;;  %v23_v0 = vld [vmem:[#allocation2] sm:$0xff]  ;;  %v24_v1 = vld [vmem:[#allocation2 + $0x8] sm:$0xff]  ;;  %s125_s0 = smov [#allocation5]   ;;  %s54_s14 = sshll.u32 %s143_s1, 4  ;;  %s55_s14 = int_to_ptr.hbm [resolvable:$true] %s54_s14 }
   0x6   :  { %v25_v2 = vmax.f32 %v23_v0, %v24_v1  ;;  %s52_s11 = sshll.u32 %s125_s0, 4  ;;  %s53_s11 = int_to_ptr.vmem [resolvable:$true] %s52_s11 }
   0x8   :  { %26 = vmax.xlane.f32.xlu0 %v25_v2 }
  0x7b   :  { %v27_v3 = vpop.xlane.xlu0 %26 }
  0x7c   :  { %v28_v4 = vsub.f32 %v23_v0, %v27_v3  ;;  %v29_v5 = vsub.f32 %v24_v1, %v27_v3 }
  0x7e   :  { %v30_v6 = vmul.f32 1.442695, %v28_v4  ;;  %v32_v7 = vmul.f32 1.442695, %v29_v5 }
  0x80   :  { %66 = vpow2.f32 %v30_v6 }
  0x81   :  { %68 = vpow2.f32 %v32_v7 }
  0x86   :  { %v67_v8 = vpop.eup %66 }
  0x87   :  { %v69_v9 = vpop.eup %68 }
  0x88   :  { %v34_v10 = vadd.f32 %v69_v9, %v67_v8 }
  0x8a   :  { %35 = vadd.xlane.f32.xlu0 %v34_v10 }
  0xfd   :  { %v36_v11 = vpop.xlane.xlu0 %35 }
  0xfe   :  { %70 = vrcp.f32 %v36_v11 }
 0x104   :  { %v71_v12 = vpop.eup %70 }
 0x105   :  { %v38_v13 = vmul.f32 %v71_v12, %v36_v11 }
 0x107   :  { %v39_v14 = vsub.f32 2.0, %v38_v13 }
 0x109   :  { %v40_v15 = vmul.f32 %v71_v12, %v39_v14 }
 0x10b   :  { %v41_v16 = vmul.f32 %v67_v8, %v40_v15  ;;  %v42_v17 = vmul.f32 %v69_v9, %v40_v15 }
 0x10d   :  { %v43_v18 = vmul.f32 %v41_v16, %v23_v0  ;;  %v44_v19 = vmul.f32 %v42_v17, %v24_v1 }
 0x10f   :  { %45 = vst [vmem:[#allocation5] sm:$0xff] %v43_v18 }
 0x110   :  { %46 = vst [vmem:[#allocation5 + $0x8] sm:$0xff] %v44_v19 }
 0x111   :  { %57 = dma.vmem_to_hbm [thread:$0]  %s53_s11, 256, %s55_s14, [#allocation4]  }
 0x112   :  { %122 = dma.done.wait [#allocation4], 256  }
 0x113   :  { %123 = vsyncadd [#allocation4], 4294967040 }
 0x114   :  { %62 = vsyncpa [#allocation3], 1 }
 0x115   :  { %63 = vsyncpa [#allocation4], 1 }

</bundles_post_ra>
